<compile_context>
chip_gen: v6e
topology: v6e:2x2x1
jax: 0.10.0
libtpu: 0.0.40
codegen_flags: <defaults>
</compile_context>

<pallas_src>
import functools

import jax
import jax.numpy as jnp
from jax import lax
from jax.experimental import pallas as pl
from jax.experimental.pallas import tpu as pltpu

LN_EPS = 1e-5  # nn.LayerNorm default
_INV_SQRT2 = 0.7071067811865476


def _round_up(x, m):
    return ((x + m - 1) // m) * m


def _tpu_probe():
    """Best-effort, trace-time TPU-generation probe. Never raises.

    Returns (vmem_limit_bytes, tensorcores_per_chip, mxu_rows).
    """
    kind = ""
    try:
        kind = jax.devices()[0].device_kind.lower()
    except Exception:
        pass
    is_v7 = "7" in kind
    is_v6 = "v6" in kind
    n_tc = 2 if is_v7 else 1
    mxu_rows = 256 if (is_v6 or is_v7) else 128
    vmem_cap = 64 * 1024 * 1024 if is_v7 else 128 * 1024 * 1024
    try:
        vmem_cap = int(pltpu.get_tpu_info().vmem_capacity_bytes)
    except Exception:
        pass
    # Leave ~30% of physical VMEM for compiler-internal scratch / spills / pipelining.
    vmem_limit = min(int(0.70 * vmem_cap), 96 * 1024 * 1024)
    return vmem_limit, n_tc, mxu_rows


def _pick_tile_h(H, max_th=512):
    """Largest multiple of 128 that divides H and is <= max_th; else full H.

    Exact divisibility matters: the H axis is the contraction dim of the second
    matmul, so a padded partial H tile would pollute the accumulator.
    """
    if H <= max_th:
        return H
    for cand in range(max_th, 127, -128):
        if H % cand == 0:
            return cand
    return H


def mlp_kernel(x_ref, g_ref, beta_ref, w1_ref, b1_ref, w2_ref, b2_ref, o_ref,
               xn_ref, acc_ref):
    k = pl.program_id(1)

    @pl.when(k == 0)
    def _():
        # ---- LayerNorm once per row tile (f32 elementwise math), cached in bf16 ----
        x = x_ref[...].astype(jnp.float32)                       # (tn, E)
        mean = jnp.mean(x, axis=-1, keepdims=True)
        var = jnp.mean((x - mean) ** 2, axis=-1, keepdims=True)  # biased var (PyTorch LN)
        xn = (x - mean) * lax.rsqrt(var + LN_EPS)
        xn = xn * g_ref[...].astype(jnp.float32) + beta_ref[...].astype(jnp.float32)
        xn_ref[...] = xn.astype(jnp.bfloat16)
        acc_ref[...] = jnp.zeros_like(acc_ref)

    # ---- Linear(E -> tH) slice: bf16 MXU operands, f32 accumulation ----
    h = jnp.dot(xn_ref[...], w1_ref[...], preferred_element_type=jnp.float32)
    h = h + b1_ref[...].astype(jnp.float32)

    # ---- exact GELU (erf form, nn.GELU default); erf uses the EUP slot.
    #      Downcast to bf16 right away so the (tn, tH) intermediate is 2 B/elem and
    #      already in the second MXU op's native dtype.
    h = (0.5 * h * (1.0 + lax.erf(h * _INV_SQRT2))).astype(jnp.bfloat16)

    # Dropout(p=0) is the identity — no-op.
    # TODO(synk): dropout with p>0 would need pltpu.prng_seed/prng_random_bits masking.

    # ---- Linear(tH -> E) slice accumulated into the f32 (tn, E) accumulator ----
    acc_ref[...] += jnp.dot(h, w2_ref[...], preferred_element_type=jnp.float32)

    @pl.when(k == pl.num_programs(1) - 1)
    def _():
        o_ref[...] = (acc_ref[...] + b2_ref[...].astype(jnp.float32)).astype(o_ref.dtype)


@functools.partial(jax.jit, static_argnames=("tile_n", "tile_h"))
def mlp_forward(x, ln_gamma, ln_beta, w1, b1, w2, b2, *, tile_n=None, tile_h=None):
    """x: [B, S, E]. Returns [B, S, E]. Weights stored as (in, out): y = x @ W + b."""
    B, S, E = x.shape
    H = w1.shape[1]
    N = B * S

    vmem_limit, n_tc, mxu_rows = _tpu_probe()

    # ---- row-tile sizing: multiple of the sublane minimum, sized to the MXU width;
    #      only split small N / rebalance grid parity when 2 TensorCores exist (v7x).
    mt = 16 if x.dtype == jnp.bfloat16 else 8
    n_aligned = _round_up(N, mt)
    tn = tile_n if tile_n is not None else (128 if mxu_rows == 128 else 256)
    tn = max(mt, min(_round_up(tn, mt), n_aligned))
    if n_tc == 2:
        g = pl.cdiv(N, tn)
        if g == 1 and n_aligned >= 2 * mt:
            tn = _round_up(pl.cdiv(N, 2), mt)          # give each TC a tile
        elif g > 2 and g % 2 == 1:
            tn_even = _round_up(pl.cdiv(N, g + 1), mt)  # even step count for 2 TCs
            if tn_even >= 128:                          # keep MXU rows reasonably full
                tn = tn_even
    grid_n = pl.cdiv(N, tn)

    # ---- hidden-tile sizing (must divide H exactly; see _pick_tile_h) ----
    if tile_h is not None and H % tile_h == 0:
        tH = tile_h
    else:
        tH = _pick_tile_h(H)
    grid_k = H // tH

    # No pad/slice HBM round-trip: a ragged last row tile is handled by Pallas's
    # masked partial block (garbage rows are row-local and masked on store).
    x2d = x.reshape(N, E)

    # Broadcast-friendly 2D params; weights downcast to bf16 (halves HBM->VMEM bytes).
    g2 = ln_gamma.reshape(1, E).astype(jnp.float32)
    be2 = ln_beta.reshape(1, E).astype(jnp.float32)
    b1_2 = b1.reshape(1, H).astype(jnp.float32)
    b2_2 = b2.reshape(1, E).astype(jnp.float32)
    w1_bf = w1.astype(jnp.bfloat16)
    w2_bf = w2.astype(jnp.bfloat16)

    out2d = pl.pallas_call(
        mlp_kernel,
        out_shape=jax.ShapeDtypeStruct((N, E), x.dtype),
        grid_spec=pltpu.PrefetchScalarGridSpec(
            num_scalar_prefetch=0,
            grid=(grid_n, grid_k),
            in_specs=[
                pl.BlockSpec((tn, E), lambda i, k: (i, 0)),   # x tile (resident over k)
                pl.BlockSpec((1, E), lambda i, k: (0, 0)),    # ln gamma
                pl.BlockSpec((1, E), lambda i, k: (0, 0)),    # ln beta
                pl.BlockSpec((E, tH), lambda i, k: (0, k)),   # w1 slice (bf16)
                pl.BlockSpec((1, tH), lambda i, k: (0, k)),   # b1 slice
                pl.BlockSpec((tH, E), lambda i, k: (k, 0)),   # w2 slice (bf16)
                pl.BlockSpec((1, E), lambda i, k: (0, 0)),    # b2
            ],
            out_specs=pl.BlockSpec((tn, E), lambda i, k: (i, 0)),
            scratch_shapes=[
                pltpu.VMEM((tn, E), jnp.bfloat16),   # cached LayerNorm output
                pltpu.VMEM((tn, E), jnp.float32),    # output accumulator over H tiles
            ],
        ),
        compiler_params=pltpu.CompilerParams(
            dimension_semantics=("parallel", "arbitrary"),
            vmem_limit_bytes=vmem_limit,
        ),
    )(x2d, g2, be2, w1_bf, b1_2, w2_bf, b2_2)

    return out2d.reshape(B, S, E)


def init_params(key, embedding_dim, mlp_size):
    """Deterministic init mimicking nn.Linear default (uniform +/- 1/sqrt(fan_in))."""
    k1, k2, k3, k4 = jax.random.split(key, 4)
    bound1 = 1.0 / (embedding_dim ** 0.5)
    bound2 = 1.0 / (mlp_size ** 0.5)
    # Stored as (in, out) so the kernel does x @ W (PyTorch stores (out, in), does x @ W.T).
    w1 = jax.random.uniform(k1, (embedding_dim, mlp_size), jnp.float32, -bound1, bound1)
    b1 = jax.random.uniform(k2, (mlp_size,), jnp.float32, -bound1, bound1)
    w2 = jax.random.uniform(k3, (mlp_size, embedding_dim), jnp.float32, -bound2, bound2)
    b2 = jax.random.uniform(k4, (embedding_dim,), jnp.float32, -bound2, bound2)
    ln_gamma = jnp.ones((embedding_dim,), jnp.float32)
    ln_beta = jnp.zeros((embedding_dim,), jnp.float32)
    return ln_gamma, ln_beta, w1, b1, w2, b2


def mlp_reference(x, ln_gamma, ln_beta, w1, b1, w2, b2):
    mean = jnp.mean(x, axis=-1, keepdims=True)
    var = jnp.mean((x - mean) ** 2, axis=-1, keepdims=True)
    xn = (x - mean) / jnp.sqrt(var + LN_EPS)
    xn = xn * ln_gamma + ln_beta
    h = xn @ w1 + b1
    h = 0.5 * h * (1.0 + lax.erf(h * _INV_SQRT2))
    return h @ w2 + b2


if __name__ == "__main__":
    # Small, lane-aligned demo shapes: batch=2, seq=8, embedding_dim=128, mlp_size=256.
    B, S, E, H = 2, 8, 128, 256
    key = jax.random.PRNGKey(0)
    kx, kp = jax.random.split(key)
    x = jax.random.normal(kx, (B, S, E), jnp.float32)
    params = init_params(kp, E, H)

    out = mlp_forward(x, *params)
    out = jax.block_until_ready(out)

    ref = mlp_reference(x, *params)
    assert out.shape == (B, S, E)
    # Tolerance accounts for bf16 MXU operands (accumulation is f32).
    assert bool(jnp.allclose(out, ref, atol=3e-2, rtol=3e-2)), (
        f"max abs err = {float(jnp.max(jnp.abs(out - ref)))}"
    )
    print("KERNEL_OK")
</pallas_src>

<mosaic_0001>
module attributes {stable_mosaic.version = 11 : i64} {
  func.func @mlp_kernel(%arg0: i32, %arg1: i32, %arg2: memref<16x128xf32, #tpu.memory_space<vmem>>, %arg3: memref<1x128xf32, #tpu.memory_space<vmem>>, %arg4: memref<1x128xf32, #tpu.memory_space<vmem>>, %arg5: memref<128x256xbf16, #tpu.memory_space<vmem>>, %arg6: memref<1x256xf32, #tpu.memory_space<vmem>>, %arg7: memref<256x128xbf16, #tpu.memory_space<vmem>>, %arg8: memref<1x128xf32, #tpu.memory_space<vmem>>, %arg9: memref<16x128xf32, #tpu.memory_space<vmem>>, %arg10: memref<16x128xbf16, #tpu.memory_space<vmem>>, %arg11: memref<16x128xf32, #tpu.memory_space<vmem>>) attributes {dimension_semantics = [#tpu.dimension_semantics<parallel>, #tpu.dimension_semantics<arbitrary>], iteration_bounds = array<i64: 1, 1>, scalar_prefetch = 0 : i64, scratch_operands = 2 : i64, tpu.core_type = #tpu.core_type<tc>, window_params = [{transform_indices = @transform_0, window_bounds = array<i64: 16, 128>}, {pipeline_mode = #tpu.pipeline_mode<synchronous>, transform_indices = @transform_1, window_bounds = array<i64: 1, 128>}, {pipeline_mode = #tpu.pipeline_mode<synchronous>, transform_indices = @transform_2, window_bounds = array<i64: 1, 128>}, {transform_indices = @transform_3, window_bounds = array<i64: 128, 256>}, {transform_indices = @transform_4, window_bounds = array<i64: 1, 256>}, {transform_indices = @transform_5, window_bounds = array<i64: 256, 128>}, {pipeline_mode = #tpu.pipeline_mode<synchronous>, transform_indices = @transform_6, window_bounds = array<i64: 1, 128>}, {transform_indices = @transform_7, window_bounds = array<i64: 16, 128>}]} {
    %c0_i32 = arith.constant 0 : i32
    %0 = arith.cmpi eq, %arg1, %c0_i32 : i32
    %1 = arith.extui %0 : i1 to i32
    %c0_i32_0 = arith.constant 0 : i32
    %2 = arith.cmpi ne, %1, %c0_i32_0 : i32
    scf.if %2 {
      %c0_18 = arith.constant 0 : index
      %c0_19 = arith.constant 0 : index
      %26 = vector.load %arg2[%c0_18, %c0_19] : memref<16x128xf32, #tpu.memory_space<vmem>>, vector<16x128xf32>
      %cst_20 = arith.constant dense<0.000000e+00> : vector<16xf32>
      %27 = vector.multi_reduction <add>, %26, %cst_20 [1] : vector<16x128xf32> to vector<16xf32>
      %28 = vector.shape_cast %27 : vector<16xf32> to vector<16x1xf32>
      %cst_21 = arith.constant 1.280000e+02 : f32
      %29 = vector.broadcast %cst_21 : f32 to vector<16x1xf32>
      %30 = arith.divf %28, %29 : vector<16x1xf32>
      %31 = vector.broadcast %30 : vector<16x1xf32> to vector<16x128xf32>
      %32 = arith.subf %26, %31 : vector<16x128xf32>
      %33 = arith.mulf %32, %32 : vector<16x128xf32>
      %cst_22 = arith.constant dense<0.000000e+00> : vector<16xf32>
      %34 = vector.multi_reduction <add>, %33, %cst_22 [1] : vector<16x128xf32> to vector<16xf32>
      %35 = vector.shape_cast %34 : vector<16xf32> to vector<16x1xf32>
      %cst_23 = arith.constant 1.280000e+02 : f32
      %36 = vector.broadcast %cst_23 : f32 to vector<16x1xf32>
      %37 = arith.divf %35, %36 : vector<16x1xf32>
      %38 = vector.broadcast %30 : vector<16x1xf32> to vector<16x128xf32>
      %39 = arith.subf %26, %38 : vector<16x128xf32>
      %cst_24 = arith.constant 9.99999974E-6 : f32
      %40 = vector.broadcast %cst_24 : f32 to vector<16x1xf32>
      %41 = arith.addf %37, %40 : vector<16x1xf32>
      %42 = math.rsqrt %41 : vector<16x1xf32>
      %43 = vector.broadcast %42 : vector<16x1xf32> to vector<16x128xf32>
      %44 = arith.mulf %39, %43 : vector<16x128xf32>
      %c0_25 = arith.constant 0 : index
      %c0_26 = arith.constant 0 : index
      %45 = vector.load %arg3[%c0_25, %c0_26] : memref<1x128xf32, #tpu.memory_space<vmem>>, vector<1x128xf32>
      %46 = vector.broadcast %45 : vector<1x128xf32> to vector<16x128xf32>
      %47 = arith.mulf %44, %46 : vector<16x128xf32>
      %c0_27 = arith.constant 0 : index
      %c0_28 = arith.constant 0 : index
      %48 = vector.load %arg4[%c0_27, %c0_28] : memref<1x128xf32, #tpu.memory_space<vmem>>, vector<1x128xf32>
      %49 = vector.broadcast %48 : vector<1x128xf32> to vector<16x128xf32>
      %50 = arith.addf %47, %49 : vector<16x128xf32>
      %51 = arith.truncf %50 : vector<16x128xf32> to vector<16x128xbf16>
      %c0_29 = arith.constant 0 : index
      %c0_30 = arith.constant 0 : index
      %52 = vector.load %arg10[%c0_29, %c0_30] : memref<16x128xbf16, #tpu.memory_space<vmem>>, vector<16x128xbf16>
      tpu.vector_store %arg10[%c0_29, %c0_30], %51 {strides = array<i32>} : memref<16x128xbf16, #tpu.memory_space<vmem>>, vector<16x128xbf16>,
      %cst_31 = arith.constant 0.000000e+00 : f32
      %53 = vector.broadcast %cst_31 : f32 to vector<16x128xf32>
      %c0_32 = arith.constant 0 : index
      %c0_33 = arith.constant 0 : index
      %54 = vector.load %arg11[%c0_32, %c0_33] : memref<16x128xf32, #tpu.memory_space<vmem>>, vector<16x128xf32>
      tpu.vector_store %arg11[%c0_32, %c0_33], %53 {strides = array<i32>} : memref<16x128xf32, #tpu.memory_space<vmem>>, vector<16x128xf32>,
    } else {
    }
    %c0 = arith.constant 0 : index
    %c0_1 = arith.constant 0 : index
    %3 = vector.load %arg10[%c0, %c0_1] : memref<16x128xbf16, #tpu.memory_space<vmem>>, vector<16x128xbf16>
    %c0_2 = arith.constant 0 : index
    %c0_3 = arith.constant 0 : index
    %4 = vector.load %arg5[%c0_2, %c0_3] : memref<128x256xbf16, #tpu.memory_space<vmem>>, vector<128x256xbf16>
    %cst = arith.constant dense<0.000000e+00> : vector<16x256xf32>
    %5 = tpu.matmul %3, %4, %cst {dimension_numbers = #tpu.dot_dimension_numbers<[1], [0], [0], [1], [0, 0, 1, 1], [], []>} : vector<16x128xbf16>, vector<128x256xbf16>, vector<16x256xf32> -> vector<16x256xf32>
    %c0_4 = arith.constant 0 : index
    %c0_5 = arith.constant 0 : index
    %6 = vector.load %arg6[%c0_4, %c0_5] : memref<1x256xf32, #tpu.memory_space<vmem>>, vector<1x256xf32>
    %7 = vector.broadcast %6 : vector<1x256xf32> to vector<16x256xf32>
    %8 = arith.addf %5, %7 : vector<16x256xf32>
    %cst_6 = arith.constant 5.000000e-01 : f32
    %9 = vector.broadcast %cst_6 : f32 to vector<16x256xf32>
    %10 = arith.mulf %9, %8 : vector<16x256xf32>
    %cst_7 = arith.constant 0.707106769 : f32
    %11 = vector.broadcast %cst_7 : f32 to vector<16x256xf32>
    %12 = arith.mulf %8, %11 : vector<16x256xf32>
    %13 = math.erf %12 : vector<16x256xf32>
    %cst_8 = arith.constant 1.000000e+00 : f32
    %14 = vector.broadcast %cst_8 : f32 to vector<16x256xf32>
    %15 = arith.addf %14, %13 : vector<16x256xf32>
    %16 = arith.mulf %10, %15 : vector<16x256xf32>
    %17 = arith.truncf %16 : vector<16x256xf32> to vector<16x256xbf16>
    %c0_9 = arith.constant 0 : index
    %c0_10 = arith.constant 0 : index
    %18 = vector.load %arg11[%c0_9, %c0_10] : memref<16x128xf32, #tpu.memory_space<vmem>>, vector<16x128xf32>
    %c0_11 = arith.constant 0 : index
    %c0_12 = arith.constant 0 : index
    %19 = vector.load %arg7[%c0_11, %c0_12] : memref<256x128xbf16, #tpu.memory_space<vmem>>, vector<256x128xbf16>
    %cst_13 = arith.constant dense<0.000000e+00> : vector<16x128xf32>
    %20 = tpu.matmul %17, %19, %cst_13 {dimension_numbers = #tpu.dot_dimension_numbers<[1], [0], [0], [1], [0, 0, 1, 1], [], []>} : vector<16x256xbf16>, vector<256x128xbf16>, vector<16x128xf32> -> vector<16x128xf32>
    %21 = arith.addf %18, %20 : vector<16x128xf32>
    %c0_14 = arith.constant 0 : index
    %c0_15 = arith.constant 0 : index
    %22 = vector.load %arg11[%c0_14, %c0_15] : memref<16x128xf32, #tpu.memory_space<vmem>>, vector<16x128xf32>
    tpu.vector_store %arg11[%c0_14, %c0_15], %21 {strides = array<i32>} : memref<16x128xf32, #tpu.memory_space<vmem>>, vector<16x128xf32>,
    %c0_i32_16 = arith.constant 0 : i32
    %23 = arith.cmpi eq, %arg1, %c0_i32_16 : i32
    %24 = arith.extui %23 : i1 to i32
    %c0_i32_17 = arith.constant 0 : i32
    %25 = arith.cmpi ne, %24, %c0_i32_17 : i32
    scf.if %25 {
      %c0_18 = arith.constant 0 : index
      %c0_19 = arith.constant 0 : index
      %26 = vector.load %arg11[%c0_18, %c0_19] : memref<16x128xf32, #tpu.memory_space<vmem>>, vector<16x128xf32>
      %c0_20 = arith.constant 0 : index
      %c0_21 = arith.constant 0 : index
      %27 = vector.load %arg8[%c0_20, %c0_21] : memref<1x128xf32, #tpu.memory_space<vmem>>, vector<1x128xf32>
      %28 = vector.broadcast %27 : vector<1x128xf32> to vector<16x128xf32>
      %29 = arith.addf %26, %28 : vector<16x128xf32>
      %c0_22 = arith.constant 0 : index
      %c0_23 = arith.constant 0 : index
      %30 = vector.load %arg9[%c0_22, %c0_23] : memref<16x128xf32, #tpu.memory_space<vmem>>, vector<16x128xf32>
      tpu.vector_store %arg9[%c0_22, %c0_23], %29 {strides = array<i32>} : memref<16x128xf32, #tpu.memory_space<vmem>>, vector<16x128xf32>,
    } else {
    }
    return
  }
  func.func @transform_0(%arg0: i32, %arg1: i32) -> (i32, i32) {
    %c0_i32 = arith.constant 0 : i32
    %c0_i32_0 = arith.constant 0 : i32
    return %arg0, %c0_i32 : i32, i32
  }
  func.func @transform_1(%arg0: i32, %arg1: i32) -> (i32, i32) {
    %c0_i32 = arith.constant 0 : i32
    %c0_i32_0 = arith.constant 0 : i32
    %c0_i32_1 = arith.constant 0 : i32
    return %c0_i32, %c0_i32_0 : i32, i32
  }
  func.func @transform_2(%arg0: i32, %arg1: i32) -> (i32, i32) {
    %c0_i32 = arith.constant 0 : i32
    %c0_i32_0 = arith.constant 0 : i32
    %c0_i32_1 = arith.constant 0 : i32
    return %c0_i32, %c0_i32_0 : i32, i32
  }
  func.func @transform_3(%arg0: i32, %arg1: i32) -> (i32, i32) {
    %c0_i32 = arith.constant 0 : i32
    %c0_i32_0 = arith.constant 0 : i32
    return %c0_i32, %arg1 : i32, i32
  }
  func.func @transform_4(%arg0: i32, %arg1: i32) -> (i32, i32) {
    %c0_i32 = arith.constant 0 : i32
    %c0_i32_0 = arith.constant 0 : i32
    return %c0_i32, %arg1 : i32, i32
  }
  func.func @transform_5(%arg0: i32, %arg1: i32) -> (i32, i32) {
    %c0_i32 = arith.constant 0 : i32
    %c0_i32_0 = arith.constant 0 : i32
    return %arg1, %c0_i32 : i32, i32
  }
  func.func @transform_6(%arg0: i32, %arg1: i32) -> (i32, i32) {
    %c0_i32 = arith.constant 0 : i32
    %c0_i32_0 = arith.constant 0 : i32
    %c0_i32_1 = arith.constant 0 : i32
    return %c0_i32, %c0_i32_0 : i32, i32
  }
  func.func @transform_7(%arg0: i32, %arg1: i32) -> (i32, i32) {
    %c0_i32 = arith.constant 0 : i32
    %c0_i32_0 = arith.constant 0 : i32
    return %arg0, %c0_i32 : i32, i32
  }
}

</mosaic_0001>

<bundles_post_ra>
// kernel: mlp_forward.1
= control target key start
LH: loop header
LB: loop body
LE: loop exit
PB: predicated region body
PF: predicated region fallthrough
CT: control target
= control target key end

     0   :  { %s782_s0 = inlined_call_operand.vmem [shape: f32[16,128], index: 0, kind: input, shape index: {}]   ;;  %s783_s1 = inlined_call_operand.vmem [shape: f32[1,128], index: 1, kind: input, shape index: {}]   ;;  %s784_s2 = inlined_call_operand.vmem [shape: f32[1,128], index: 2, kind: input, shape index: {}]   ;;  %s785_s3 = inlined_call_operand.vmem [shape: bf16[128,256], index: 3, kind: input, shape index: {}]   ;;  %s786_s4 = inlined_call_operand.vmem [shape: f32[1,256], index: 4, kind: input, shape index: {}]   ;;  %s787_s5 = inlined_call_operand.vmem [shape: bf16[256,128], index: 5, kind: input, shape index: {}]   ;;  %s788_s6 = inlined_call_operand.vmem [shape: f32[1,128], index: 6, kind: input, shape index: {}]   ;;  %s789_s7 = inlined_call_operand.hbm [shape: f32[16,128], index: 7, kind: output, shape index: {}]  }
   0x1   :  { %v32_v0 = vld [vmem:[%s782_s0] sm:$0xff]  ;;  %v33_v1 = vld [vmem:[%s782_s0 + $0x8] sm:$0xff] }
   0x2   :  { %34 = vadd.xlane.f32.xlu0 %v32_v0 }
   0x6   :  { %36 = vadd.xlane.f32.xlu0 %v33_v1 }
   0x7   :  { %12 = vsyncpa [#allocation5], 0  ;;  %v546_v10 = vld [vmem:[%s785_s3 + $0x74] ss:$8 sps:$4 sm:$0xff]   ;;  %v548_v11 = vld [vmem:[%s785_s3 + $0x70] ss:$8 sps:$4 sm:$0xff]   ;;  %v107_v61 = vlaneseq }
   0x8   :  { %203 = vmatprep.subr.bf16.mxu0 %v546_v10  ;;  %v549_v12 = vld [vmem:[%s785_s3 + $0x64] ss:$8 sps:$4 sm:$0xff]   ;;  %v551_v13 = vld [vmem:[%s785_s3 + $0x60] ss:$8 sps:$4 sm:$0xff]   ;;  %v552_v14 = vld [vmem:[%s785_s3 + $0x54] ss:$8 sps:$4 sm:$0xff]  }
   0x9   :  { %204 = vmatpush1.bf16.msra.mxu0 %v548_v11  ;;  %v554_v15 = vld [vmem:[%s785_s3 + $0x50] ss:$8 sps:$4 sm:$0xff]   ;;  %v555_v16 = vld [vmem:[%s785_s3 + $0x44] ss:$8 sps:$4 sm:$0xff]   ;;  %v557_v17 = vld [vmem:[%s785_s3 + $0x40] ss:$8 sps:$4 sm:$0xff]  }
   0xa   :  { %205 = vmatprep.subr.bf16.mxu0 %v549_v12  ;;  %v558_v18 = vld [vmem:[%s785_s3 + $0x34] ss:$8 sps:$4 sm:$0xff]   ;;  %v560_v19 = vld [vmem:[%s785_s3 + $0x30] ss:$8 sps:$4 sm:$0xff]   ;;  %v561_v20 = vld [vmem:[%s785_s3 + $0x24] ss:$8 sps:$4 sm:$0xff]  }
   0xb   :  { %v563_v21 = vld [vmem:[%s785_s3 + $0x20] ss:$8 sps:$4 sm:$0xff]   ;;  %v564_v22 = vld [vmem:[%s785_s3 + $0x14] ss:$8 sps:$4 sm:$0xff]   ;;  %v566_v23 = vld [vmem:[%s785_s3 + $0x10] ss:$8 sps:$4 sm:$0xff]  }
   0xc   :  { %v567_v24 = vld [vmem:[%s785_s3 + $0x4] ss:$8 sps:$4 sm:$0xff]   ;;  %v569_v25 = vld [vmem:[%s785_s3] ss:$8 sps:$4 sm:$0xff]   ;;  %v621_v26 = vmov 0   ;;  %v571_v45 = vld [vmem:[%s787_s5 + $0x78] sm:$0xff]  }
   0xd   :  { %206 = vmatpush1.bf16.msra.mxu0 %v551_v13  ;;  %235 = vmatprep.mubr.bf16.mxu0 %v621_v26  ;;  %v475_v35 = vld [vmem:[%s783_s1] ss:$0 sm:$0xff]  ;;  %v572_v46 = vld [vmem:[%s787_s5 + $0x38] sm:$0xff]   ;;  %v573_v47 = vld [vmem:[%s787_s5 + $0x70] sm:$0xff]   ;;  %v108_v62 = vshrl.u32 %v107_v61, 7  ;;  %s622_s20 = smov [#allocation4]  }
   0xe   :  { %207 = vmatprep.subr.bf16.mxu0 %v552_v14  ;;  %v476_v39 = vld [vmem:[%s784_s2] ss:$0 sm:$0xff]  ;;  %520 = vmatprep.subr.bf16.mxu1 %v571_v45  ;;  %v574_v48 = vld [vmem:[%s787_s5 + $0x30] sm:$0xff]   ;;  %v575_v49 = vld [vmem:[%s787_s5 + $0x68] sm:$0xff]   ;;  %s464_s21 = sshll.u32 %s622_s20, 4  ;;  %s465_s21 = int_to_ptr.vmem [resolvable:$true] %s464_s21 }
   0xf   :  { %521 = vmatpush3.bf16.msra.mxu1 %v572_v46  ;;  %v576_v50 = vld [vmem:[%s787_s5 + $0x28] sm:$0xff]   ;;  %v577_v51 = vld [vmem:[%s787_s5 + $0x60] sm:$0xff]   ;;  %v579_v53 = vld [vmem:[%s787_s5 + $0x58] sm:$0xff]   ;;  %v109_v63 = vsub.s32 0, %v108_v62  ;;  %s599_s22 = scalar_lea.vmem %s465_s21, 256  ;;  %p604_p1 = scmp.lt.s32.totalorder %s465_s21, %s465_s21 }
  0x10   :  { %522 = vmatprep.subr.bf16.mxu1 %v573_v47  ;;  %v578_v52 = vld [vmem:[%s787_s5 + $0x20] sm:$0xff]   ;;  %v580_v54 = vld [vmem:[%s787_s5 + $0x18] sm:$0xff]   ;;  %v581_v55 = vld [vmem:[%s787_s5 + $0x50] sm:$0xff]   ;;  %p600_p0 = scmp.ne.s32.totalorder %s465_s21, %s599_s22  ;;  %p605_p2 = scmp.lt.s32.totalorder %s599_s22, %s599_s22 }
  0x11   :  { %208 = vmatpush1.bf16.msra.mxu0 %v554_v15  ;;  %v582_v56 = vld [vmem:[%s787_s5 + $0x10] sm:$0xff]   ;;  %v583_v57 = vld [vmem:[%s787_s5 + $0x48] sm:$0xff]   ;;  %v585_v59 = vld [vmem:[%s787_s5 + $0x40] sm:$0xff]  }
  0x12   :  { %209 = vmatprep.subr.bf16.mxu0 %v555_v16  ;;  %v584_v58 = vld [vmem:[%s787_s5 + $0x8] sm:$0xff]   ;;  %v586_v60 = vld [vmem:[%s787_s5] sm:$0xff]   ;;  %p606_p3 = por %p605_p2, %p604_p1 }
  0x13   :  { %523 = vmatpush3.bf16.msra.mxu1 %v574_v48 }
  0x14   :  { %524 = vmatprep.subr.bf16.mxu1 %v575_v49  ;;  %p607_p4 = pnand %p606_p3, %p600_p0 }
  0x15   :  { %210 = vmatpush1.bf16.msra.mxu0 %v557_v17 }
  0x16   :  { %211 = vmatprep.subr.bf16.mxu0 %v558_v18 }
  0x17   :  { %525 = vmatpush3.bf16.msra.mxu1 %v576_v50 }
  0x18   :  { %526 = vmatprep.subr.bf16.mxu1 %v577_v51 }
  0x19   :  { %212 = vmatpush1.bf16.msra.mxu0 %v560_v19 }
  0x1a   :  { %213 = vmatprep.subr.bf16.mxu0 %v561_v20 }
  0x1b   :  { %527 = vmatpush3.bf16.msra.mxu1 %v578_v52 }
  0x1c   :  { %528 = vmatprep.subr.bf16.mxu1 %v579_v53 }
  0x1d   :  { %214 = vmatpush1.bf16.msra.mxu0 %v563_v21 }
  0x1e   :  { %215 = vmatprep.subr.bf16.mxu0 %v564_v22 }
  0x1f   :  { %529 = vmatpush3.bf16.msra.mxu1 %v580_v54 }
  0x20   :  { %530 = vmatprep.subr.bf16.mxu1 %v581_v55 }
  0x21   :  { %216 = vmatpush1.bf16.msra.mxu0 %v566_v23 }
  0x22   :  { %217 = vmatprep.subr.bf16.mxu0 %v567_v24 }
  0x23   :  { %531 = vmatpush3.bf16.msra.mxu1 %v582_v56 }
  0x24   :  { %532 = vmatprep.subr.bf16.mxu1 %v583_v57 }
  0x25   :  { %218 = vmatpush1.bf16.msra.mxu0 %v569_v25 }
  0x27   :  { %533 = vmatpush3.bf16.msra.mxu1 %v584_v58 }
  0x28   :  { %534 = vmatprep.subr.bf16.mxu1 %v585_v59 }
  0x2b   :  { %535 = vmatpush3.bf16.msra.mxu1 %v586_v60 }
  0x8b   :  { %v35_v2 = vpop.xlane.xlu0 %34 }
  0x8c   :  { %v39_v3 = vmul.f32 0.0078125, %v35_v2 }
  0x8e   :  { %v41_v4 = vsub.f32 %v32_v0, %v39_v3  ;;  %v105_v0 = vld [vmem:[%s786_s4] sm:$0x3] }
  0x8f   :  { %v37_v5 = vpop.xlane.xlu0 %36  ;;  %v110_v2 = vrot.slane %v105_v0, %v109_v63 }
  0x90   :  { %v40_v6 = vmul.f32 0.0078125, %v37_v5  ;;  %v43_v7 = vmul.f32 %v41_v4, %v41_v4 }
  0x92   :  { %v42_v8 = vsub.f32 %v33_v1, %v40_v6  ;;  %45 = vadd.xlane.f32.xlu1 %v43_v7  ;;  %v113_v1 = vsub.s32 1, %v108_v62 }
  0x94   :  { %v44_v9 = vmul.f32 %v42_v8, %v42_v8  ;;  %v114_v3 = vrot.slane %v105_v0, %v113_v1 }
  0x96   :  { %47 = vadd.xlane.f32.xlu1 %v44_v9 }
 0x11b   :  { %v46_v27 = vpop.xlane.xlu1 %45 }
 0x11c   :  { %v49_v28 = vmul.f32 0.0078125, %v46_v27 }
 0x11e   :  { %v51_v29 = vadd.f32 1e-05, %v49_v28 }
 0x11f   :  { %v48_v30 = vpop.xlane.xlu1 %47 }
 0x120   :  { %587 = vrsqrt.f32 %v51_v29  ;;  %v50_v31 = vmul.f32 0.0078125, %v48_v30 }
 0x122   :  { %v52_v32 = vadd.f32 1e-05, %v50_v31 }
 0x124   :  { %589 = vrsqrt.f32 %v52_v32 }
 0x12d   :  { %v588_v33 = vpop.eup %587 }
 0x12e   :  { %v55_v34 = vmul.f32 %v588_v33, %v41_v4 }
 0x130   :  { %v64_v37 = vmul.f32 %v475_v35, %v55_v34 }
 0x131   :  { %v590_v36 = vpop.eup %589 }
 0x132   :  { %v56_v38 = vmul.f32 %v590_v36, %v42_v8  ;;  %v73_v41 = vadd.f32 %v476_v39, %v64_v37  ;;  %v512_v36 = vld [vmem:[%s788_s6] ss:$0 sm:$0xff] }
 0x134   :  { %v65_v40 = vmul.f32 %v475_v35, %v56_v38 }
 0x136   :  { %v74_v42 = vadd.f32 %v476_v39, %v65_v40 }
 0x138   :  { %v518_v43 = vpack.c.bf16 %v74_v42, %v73_v41 }
 0x13a   :  { %519 = vst [vmem:[#allocation2] sm:$0xff] %v518_v43  }
 0x141   :  { %v570_v44 = vld [vmem:[#allocation2] sm:$0xff]  }
 0x142   :  { %236 = vmatmul.mubr.bf16.vlgmr.msra.gmra.mxu0 %v570_v44 }
 0x202   :  { %v237_v4 = vpop.f32.mrf.mxu0 }
 0x203   :  { %v238_v5 = vadd.f32 %v237_v4, %v110_v2 }
 0x204   :  { %v239_v6 = vpop.f32.mrf.mxu0 }
 0x205   :  { %v240_v7 = vadd.f32 %v239_v6, %v114_v3  ;;  %v250_v8 = vmul.f32 0.70710677, %v238_v5  ;;  %v246_v27 = vmul.f32 0.5, %v238_v5 }
 0x206   :  { %v241_v9 = vpop.f32.mrf.mxu0 }
 0x207   :  { %v251_v10 = vmul.f32 0.70710677, %v240_v7  ;;  %v242_v11 = vadd.f32 %v241_v9, %v110_v2  ;;  %v247_v24 = vmul.f32 0.5, %v240_v7 }
 0x208   :  { %v243_v12 = vpop.f32.mrf.mxu0 }
 0x209   :  { %591 = verf.f32 %v251_v10  ;;  %v252_v13 = vmul.f32 0.70710677, %v242_v11  ;;  %v244_v14 = vadd.f32 %v243_v12, %v114_v3  ;;  %v248_v23 = vmul.f32 0.5, %v242_v11 }
 0x20a   :  { %593 = verf.f32 %v250_v8 }
 0x20b   :  { %595 = verf.f32 %v252_v13  ;;  %v253_v15 = vmul.f32 0.70710677, %v244_v14  ;;  %v249_v25 = vmul.f32 0.5, %v244_v14 }
 0x20d   :  { %597 = verf.f32 %v253_v15 }
 0x216   :  { %v592_v16 = vpop.eup %591 }
 0x217   :  { %v594_v17 = vpop.eup %593  ;;  %v259_v20 = vadd.f32 1.0, %v592_v16 }
 0x218   :  { %v596_v18 = vpop.eup %595  ;;  %v258_v22 = vadd.f32 1.0, %v594_v17 }
 0x219   :  { %v260_v19 = vadd.f32 1.0, %v596_v18  ;;  %v263_v29 = vmul.f32 %v259_v20, %v247_v24 }
 0x21a   :  { %v598_v21 = vpop.eup %597  ;;  %v262_v31 = vmul.f32 %v258_v22, %v246_v27 }
 0x21b   :  { %v261_v26 = vadd.f32 1.0, %v598_v21  ;;  %v264_v28 = vmul.f32 %v260_v19, %v248_v23 }
 0x21d   :  { %v265_v30 = vmul.f32 %v261_v26, %v249_v25  ;;  %v266_v33 = vpack.c.bf16 %v264_v28, %v262_v31 }
 0x21f   :  { %v267_v32 = vpack.c.bf16 %v265_v30, %v263_v29 }
 0x221   :  { %430 = vmatprep.mubr.bf16.mxu1 %v267_v32 }
 0x222   :  { %431 = vmatmul.mubr.bf16.vlgmr.msra.gmra.mxu1 %v266_v33 }
 0x2e2   :  { %v536_v34 = vpop.f32.mrf.mxu1 }
 0x2e4   :  { %v537_v35 = vpop.f32.mrf.mxu1 }
 0x2e5   :  { %v538_v37 = vadd.f32 %v537_v35, %v536_v34 }
 0x2e6   :  { %v539_v38 = vpop.f32.mrf.mxu1 }
 0x2e7   :  { %v455_v39 = vadd.f32 %v538_v37, %v512_v36 }
 0x2e8   :  { %v540_v40 = vpop.f32.mrf.mxu1 }
 0x2e9   :  { %457 = vst [vmem:[#allocation4] sm:$0xff] %v455_v39  ;;  %v541_v41 = vadd.f32 %v540_v40, %v539_v38 }
 0x2eb   :  { %v456_v42 = vadd.f32 %v541_v41, %v512_v36 }
 0x2ed   :  { %458 = vst [vmem:[#allocation4 + $0x8] sm:$0xff] %v456_v42 }
 0x2ee   :  { %610 = shalt.err (!%p607_p4)
}
 0x2ef   :  { %s623_s23 = smov 128   ;;  %s624_s6 = smov 8  }
 0x2f0   :  { %470 = dma.vmem_to_hbm [thread:$0]  %s465_s21, 256, %s789_s7, [#allocation5], %s623_s23, %s623_s23, %s624_s6  }
 0x2f1   :  { %619 = dma.done.wait [#allocation5], 256  }
 0x2f2   :  { %620 = vsyncadd [#allocation5], 4294967040 }
 0x2f3   :  { %474 = vsyncpa [#allocation5], 1 }

</bundles_post_ra>
